<compile_context>
chip_gen: v7x
topology: tpu7x:2x2x1
jax: 0.10.0
libtpu: 0.0.40
codegen_flags: <defaults>
</compile_context>

<pallas_src>
import jax
import jax.numpy as jnp
from jax.experimental import pallas as pl
from jax.experimental.pallas import tpu as pltpu


def ann_kernel(x_ref, w1_ref, b1_ref, w2_ref, b2_ref, o_ref):
    # Layer 1 on the MXU: bf16 operands, f32 accumulation.
    h = jnp.dot(x_ref[...], w1_ref[...], preferred_element_type=jnp.float32)
    h = jax.nn.sigmoid(h + b1_ref[...])              # (TM, H) f32; sigmoid on EUP
    # Dropout(p=0.3) is identity in eval mode.
    # Layer 2 (H -> 1) as VPU multiply + cross-lane reduce; keeps the MXU free.
    y = jnp.sum(h * w2_ref[...], axis=-1, keepdims=True) + b2_ref[0]
    o_ref[...] = jax.nn.sigmoid(y).astype(o_ref.dtype)
    # TODO(synk): for very large batches a lane-dense (1, TM) transposed output
    # (batch on the lane axis) would replace the masked 1-lane stores; output
    # traffic here is <1% of input traffic so it is left in natural layout.


def ann_forward(x, w1, b1, w2, b2, *, tm=512, matmul_dtype=jnp.bfloat16):
    """x: (B, D_in) f32; w1: (D_in, H); b1: (1, H) or (H,); w2: (H, 1); b2: (1,1)."""
    B, D_in = x.shape
    H = w1.shape[1]

    # Pad the contraction dim to a multiple of 128 (lane aligned); pad the batch
    # to a multiple of the tile.  TM is a multiple of 16 so bf16 blocks respect
    # the packed (16, 128) sublane layout (also satisfies f32's (8, 128) rule).
    d_pad = pl.cdiv(D_in, 128) * 128
    tm_align = 16
    tm = min(tm, pl.cdiv(B, tm_align) * tm_align)
    b_pad = pl.cdiv(B, tm) * tm

    x_p = jnp.zeros((b_pad, d_pad), matmul_dtype).at[:B, :D_in].set(
        x.astype(matmul_dtype))
    w1_p = jnp.zeros((d_pad, H), matmul_dtype).at[:D_in, :].set(
        w1.astype(matmul_dtype))
    b1_r = b1.reshape(1, H).astype(jnp.float32)
    w2_r = w2.reshape(1, H).astype(jnp.float32)   # (H,1) column -> (1,H) lane row
    b2_s = b2.reshape(1).astype(jnp.float32)      # scalar, lives in SMEM

    itemsize = jnp.dtype(matmul_dtype).itemsize
    cost = pl.CostEstimate(
        flops=2 * b_pad * d_pad * H + 2 * b_pad * H,
        transcendentals=b_pad * (H + 1),
        bytes_accessed=(b_pad * d_pad * itemsize      # x stream
                        + d_pad * H * itemsize        # w1 (once)
                        + (2 * H + 1) * 4             # b1, w2 row, b2
                        + b_pad * 4),                 # output stream
    )

    out = pl.pallas_call(
        ann_kernel,
        out_shape=jax.ShapeDtypeStruct((b_pad, 1), jnp.float32),
        grid_spec=pltpu.PrefetchScalarGridSpec(
            num_scalar_prefetch=0,
            grid=(b_pad // tm,),
            in_specs=[
                pl.BlockSpec((tm, d_pad), lambda i: (i, 0)),   # x tile (streamed)
                pl.BlockSpec((d_pad, H), lambda i: (0, 0)),    # w1 (resident)
                pl.BlockSpec((1, H), lambda i: (0, 0)),        # b1 (resident)
                pl.BlockSpec((1, H), lambda i: (0, 0)),        # w2 row (resident)
                pl.BlockSpec(memory_space=pltpu.MemorySpace.SMEM),  # b2 scalar
            ],
            out_specs=pl.BlockSpec((tm, 1), lambda i: (i, 0)),
        ),
        compiler_params=pltpu.CompilerParams(
            # Batch tiles are independent -> shard across TensorCores (v7x).
            dimension_semantics=("parallel",),
        ),
        cost_estimate=cost,
    )(x_p, w1_p, b1_r, w2_r, b2_s)
    return out[:B]


def init_params(key, input_dim=137, hidden_dim=256):
    # Mirror torch.nn.Linear default init: U(-1/sqrt(fan_in), 1/sqrt(fan_in)).
    k1, k2, k3, k4 = jax.random.split(key, 4)
    bound1 = 1.0 / (input_dim ** 0.5)
    bound2 = 1.0 / (hidden_dim ** 0.5)
    w1 = jax.random.uniform(k1, (input_dim, hidden_dim), jnp.float32,
                            minval=-bound1, maxval=bound1)
    b1 = jax.random.uniform(k2, (1, hidden_dim), jnp.float32,
                            minval=-bound1, maxval=bound1)
    w2 = jax.random.uniform(k3, (hidden_dim, 1), jnp.float32,
                            minval=-bound2, maxval=bound2)
    b2 = jax.random.uniform(k4, (1, 1), jnp.float32,
                            minval=-bound2, maxval=bound2)
    return w1, b1, w2, b2


if __name__ == "__main__":
    key = jax.random.PRNGKey(0)
    kx, kp = jax.random.split(key)

    batch = 8
    input_dim = 137
    hidden_dim = 256

    x = jax.random.normal(kx, (batch, input_dim), jnp.float32)
    w1, b1, w2, b2 = init_params(kp, input_dim, hidden_dim)

    out = ann_forward(x, w1, b1, w2, b2)
    jax.block_until_ready(out)
    assert out.shape == (batch, 1)

    # Reference 1: same bf16 matmul-operand quantization as the kernel path.
    xb = x.astype(jnp.bfloat16)
    w1b = w1.astype(jnp.bfloat16)
    h = jax.nn.sigmoid(jnp.dot(xb, w1b, preferred_element_type=jnp.float32) + b1)
    ref_bf16 = jax.nn.sigmoid(h @ w2 + b2)
    assert jnp.allclose(out, ref_bf16, atol=1e-4, rtol=1e-4)

    # Reference 2: pure-f32 PyTorch eval-mode semantics (looser tolerance
    # accounts only for the bf16 operand rounding in layer 1).
    ref_f32 = jax.nn.sigmoid(jax.nn.sigmoid(x @ w1 + b1) @ w2 + b2)
    assert jnp.allclose(out, ref_f32, atol=5e-3, rtol=5e-3)

    print("KERNEL_OK")
</pallas_src>

<mosaic_0001>
module attributes {stable_mosaic.version = 11 : i64} {
  func.func @ann_kernel(%arg0: i32, %arg1: memref<16x256xbf16, #tpu.memory_space<vmem>>, %arg2: memref<256x256xbf16, #tpu.memory_space<vmem>>, %arg3: memref<1x256xf32, #tpu.memory_space<vmem>>, %arg4: memref<1x256xf32, #tpu.memory_space<vmem>>, %arg5: memref<1xf32, #tpu.memory_space<smem>>, %arg6: memref<16x1xf32, #tpu.memory_space<vmem>>) attributes {dimension_semantics = [#tpu.dimension_semantics<parallel>], iteration_bounds = array<i64: 1>, scalar_prefetch = 0 : i64, scratch_operands = 0 : i64, tpu.core_type = #tpu.core_type<tc>, window_params = [{transform_indices = @transform_0, window_bounds = array<i64: 16, 256>}, {pipeline_mode = #tpu.pipeline_mode<synchronous>, transform_indices = @transform_1, window_bounds = array<i64: 256, 256>}, {pipeline_mode = #tpu.pipeline_mode<synchronous>, transform_indices = @transform_2, window_bounds = array<i64: 1, 256>}, {pipeline_mode = #tpu.pipeline_mode<synchronous>, transform_indices = @transform_3, window_bounds = array<i64: 1, 256>}, {transform_indices = @transform_4, window_bounds = array<i64: 1>}, {transform_indices = @transform_5, window_bounds = array<i64: 16, 1>}]} {
    %c0 = arith.constant 0 : index
    %c0_0 = arith.constant 0 : index
    %0 = vector.load %arg1[%c0, %c0_0] : memref<16x256xbf16, #tpu.memory_space<vmem>>, vector<16x256xbf16>
    %c0_1 = arith.constant 0 : index
    %c0_2 = arith.constant 0 : index
    %1 = vector.load %arg2[%c0_1, %c0_2] : memref<256x256xbf16, #tpu.memory_space<vmem>>, vector<256x256xbf16>
    %cst = arith.constant dense<0.000000e+00> : vector<16x256xf32>
    %2 = tpu.matmul %0, %1, %cst {dimension_numbers = #tpu.dot_dimension_numbers<[1], [0], [0], [1], [0, 0, 1, 1], [], []>} : vector<16x256xbf16>, vector<256x256xbf16>, vector<16x256xf32> -> vector<16x256xf32>
    %c0_3 = arith.constant 0 : index
    %c0_4 = arith.constant 0 : index
    %3 = vector.load %arg3[%c0_3, %c0_4] : memref<1x256xf32, #tpu.memory_space<vmem>>, vector<1x256xf32>
    %4 = vector.broadcast %3 : vector<1x256xf32> to vector<16x256xf32>
    %5 = arith.addf %2, %4 : vector<16x256xf32>
    %6 = arith.negf %5 : vector<16x256xf32>
    %7 = math.exp %6 : vector<16x256xf32>
    %cst_5 = arith.constant 1.000000e+00 : f32
    %8 = vector.broadcast %cst_5 : f32 to vector<16x256xf32>
    %9 = arith.addf %8, %7 : vector<16x256xf32>
    %10 = arith.divf %8, %9 : vector<16x256xf32>
    %c0_6 = arith.constant 0 : index
    %c0_7 = arith.constant 0 : index
    %11 = vector.load %arg4[%c0_6, %c0_7] : memref<1x256xf32, #tpu.memory_space<vmem>>, vector<1x256xf32>
    %12 = vector.broadcast %11 : vector<1x256xf32> to vector<16x256xf32>
    %13 = arith.mulf %10, %12 : vector<16x256xf32>
    %cst_8 = arith.constant dense<0.000000e+00> : vector<16xf32>
    %14 = vector.multi_reduction <add>, %13, %cst_8 [1] : vector<16x256xf32> to vector<16xf32>
    %15 = vector.shape_cast %14 : vector<16xf32> to vector<16x1xf32>
    %c0_9 = arith.constant 0 : index
    %16 = memref.load %arg5[%c0_9] : memref<1xf32, #tpu.memory_space<smem>>
    %17 = vector.broadcast %16 : f32 to vector<16x1xf32>
    %18 = arith.addf %15, %17 : vector<16x1xf32>
    %19 = arith.negf %18 : vector<16x1xf32>
    %20 = math.exp %19 : vector<16x1xf32>
    %cst_10 = arith.constant 1.000000e+00 : f32
    %21 = vector.broadcast %cst_10 : f32 to vector<16x1xf32>
    %22 = arith.addf %21, %20 : vector<16x1xf32>
    %23 = arith.divf %21, %22 : vector<16x1xf32>
    %c0_11 = arith.constant 0 : index
    %c0_12 = arith.constant 0 : index
    %24 = vector.load %arg6[%c0_11, %c0_12] : memref<16x1xf32, #tpu.memory_space<vmem>>, vector<16x1xf32>
    tpu.vector_store %arg6[%c0_11, %c0_12], %23 {strides = array<i32>} : memref<16x1xf32, #tpu.memory_space<vmem>>, vector<16x1xf32>,
    return
  }
  func.func @transform_0(%arg0: i32) -> (i32, i32) {
    %c0_i32 = arith.constant 0 : i32
    %c0_i32_0 = arith.constant 0 : i32
    return %arg0, %c0_i32 : i32, i32
  }
  func.func @transform_1(%arg0: i32) -> (i32, i32) {
    %c0_i32 = arith.constant 0 : i32
    %c0_i32_0 = arith.constant 0 : i32
    %c0_i32_1 = arith.constant 0 : i32
    return %c0_i32, %c0_i32_0 : i32, i32
  }
  func.func @transform_2(%arg0: i32) -> (i32, i32) {
    %c0_i32 = arith.constant 0 : i32
    %c0_i32_0 = arith.constant 0 : i32
    %c0_i32_1 = arith.constant 0 : i32
    return %c0_i32, %c0_i32_0 : i32, i32
  }
  func.func @transform_3(%arg0: i32) -> (i32, i32) {
    %c0_i32 = arith.constant 0 : i32
    %c0_i32_0 = arith.constant 0 : i32
    %c0_i32_1 = arith.constant 0 : i32
    return %c0_i32, %c0_i32_0 : i32, i32
  }
  func.func @transform_4(%arg0: i32) -> i32 {
    %c0_i32 = arith.constant 0 : i32
    %c0_i32_0 = arith.constant 0 : i32
    return %c0_i32 : i32
  }
  func.func @transform_5(%arg0: i32) -> (i32, i32) {
    %c0_i32 = arith.constant 0 : i32
    %c0_i32_0 = arith.constant 0 : i32
    return %arg0, %c0_i32 : i32, i32
  }
}

</mosaic_0001>

<bundles_post_ra>
// kernel: tpu_custom_call.1
= control target key start
LH: loop header
LB: loop body
LE: loop exit
PB: predicated region body
PF: predicated region fallthrough
CT: control target
= control target key end

     0   :  { %11 = vsyncpa [#allocation4], 0  ;;  %s619_s0 = inlined_call_operand.hbm [shape: bf16[16,256], index: 0, kind: input, shape index: {}]   ;;  %s620_s1 = inlined_call_operand.hbm [shape: bf16[256,256], index: 1, kind: input, shape index: {}]   ;;  %s621_s2 = inlined_call_operand.vmem [shape: f32[1,256], index: 2, kind: input, shape index: {}]   ;;  %s622_s3 = inlined_call_operand.vmem [shape: f32[1,256], index: 3, kind: input, shape index: {}]   ;;  %s623_s4 = inlined_call_operand.<no memory space> [shape: f32[1], index: 4, kind: input, shape index: {}]   ;;  %s624_s5 = inlined_call_operand.vmem [shape: f32[16,1], index: 5, kind: output, shape index: {}]  }
   0x1   :  { %12 = vsyncpa [#allocation6], 0  ;;  %s546_s18 = smov [#allocation3]   ;;  %s498_s22 = scalar_lea.hbm %s619_s0, 256 }
   0x2   :  { %s18_s19 = sshll.u32 %s546_s18, 4  ;;  %p499_p0 = scmp.ne.s32.totalorder %s619_s0, %s498_s22  ;;  %s19_s19 = int_to_ptr.vmem [resolvable:$true] %s18_s19 }
   0x3   :  { %p502_p1 = scmp.lt.u32.totalorder %s498_s22, %s619_s0 }
   0x5   :  { %p504_p2 = pnand %p502_p1, %p499_p0 }
   0x7   :  { %507 = shalt.err (!%p504_p2)
}
   0x8   :  { %s508_s27 = scalar_lea.vmem %s19_s19, 256  ;;  %p513_p4 = scmp.lt.s32.totalorder %s19_s19, %s19_s19 }
   0x9   :  { %p509_p3 = scmp.ne.s32.totalorder %s19_s19, %s508_s27  ;;  %p514_p5 = scmp.lt.s32.totalorder %s508_s27, %s508_s27 }
   0xb   :  { %p515_p6 = por %p514_p5, %p513_p4 }
   0xd   :  { %p516_p7 = pnand %p515_p6, %p509_p3 }
   0xf   :  { %519 = shalt.err (!%p516_p7)
}
  0x10   :  { %s547_s28 = smov 128   ;;  %s548_s29 = smov 8  }
  0x11   :  { %24 = dma.hbm_to_vmem [thread:$0]  %s619_s0, 256, %s19_s19, [#allocation4], %s547_s28, %s547_s28, %s548_s29  }
  0x12   :  { %s549_s7 = smov [#allocation5]   ;;  %s520_s11 = scalar_lea.hbm %s620_s1, 4096 }
  0x13   :  { %s30_s8 = sshll.u32 %s549_s7, 4  ;;  %p521_p8 = scmp.ne.s32.totalorder %s620_s1, %s520_s11  ;;  %s31_s8 = int_to_ptr.vmem [resolvable:$true] %s30_s8 }
  0x14   :  { %p524_p9 = scmp.lt.u32.totalorder %s520_s11, %s620_s1 }
  0x16   :  { %p526_p10 = pnand %p524_p9, %p521_p8 }
  0x18   :  { %529 = shalt.err (!%p526_p10)
}
  0x19   :  { %s530_s16 = scalar_lea.vmem %s31_s8, 4096  ;;  %p535_p12 = scmp.lt.s32.totalorder %s31_s8, %s31_s8 }
  0x1a   :  { %p531_p11 = scmp.ne.s32.totalorder %s31_s8, %s530_s16  ;;  %p536_p13 = scmp.lt.s32.totalorder %s530_s16, %s530_s16 }
  0x1c   :  { %p537_p0 = por %p536_p13, %p535_p12 }
  0x1e   :  { %p538_p1 = pnand %p537_p0, %p531_p11 }
  0x20   :  { %541 = shalt.err (!%p538_p1)
}
  0x21   :  { %36 = dma.hbm_to_vmem [thread:$0]  %s620_s1, 4096, %s31_s8, [#allocation6], %s547_s28, %s547_s28, %s548_s29  }
  0x22   :  { %542 = dma.done.wait [#allocation4], 256  }
  0x23   :  { %543 = vsyncadd [#allocation4], 4294967040 }
  0x24   :  { %544 = dma.done.wait [#allocation6], 4096  }
  0x25   :  { %545 = vsyncadd [#allocation6], 4294963200  ;;  %v423_v0 = vld [vmem:[#allocation5 + $0x4] ss:$8 sps:$4 sm:$0xff]   ;;  %v425_v1 = vld [vmem:[#allocation5] ss:$8 sps:$4 sm:$0xff]   ;;  %v85_v34 = vlaneseq }
  0x26   :  { %265 = vmatprep.subr.bf16.mxu0 %v423_v0  ;;  %v426_v2 = vld [vmem:[#allocation5 + $0x14] ss:$8 sps:$4 sm:$0xff]   ;;  %v428_v3 = vld [vmem:[#allocation5 + $0x10] ss:$8 sps:$4 sm:$0xff]   ;;  %v429_v4 = vld [vmem:[#allocation5 + $0x24] ss:$8 sps:$4 sm:$0xff]  }
  0x27   :  { %266 = vmatpush1.bf16.msra.mxu0 %v425_v1  ;;  %v431_v5 = vld [vmem:[#allocation5 + $0x20] ss:$8 sps:$4 sm:$0xff]   ;;  %v432_v6 = vld [vmem:[#allocation5 + $0x34] ss:$8 sps:$4 sm:$0xff]   ;;  %v434_v7 = vld [vmem:[#allocation5 + $0x30] ss:$8 sps:$4 sm:$0xff]  }
  0x28   :  { %267 = vmatprep.subr.bf16.mxu0 %v426_v2  ;;  %v435_v8 = vld [vmem:[#allocation5 + $0x44] ss:$8 sps:$4 sm:$0xff]   ;;  %v437_v9 = vld [vmem:[#allocation5 + $0x40] ss:$8 sps:$4 sm:$0xff]   ;;  %v438_v10 = vld [vmem:[#allocation5 + $0x54] ss:$8 sps:$4 sm:$0xff]  }
  0x29   :  { %v440_v11 = vld [vmem:[#allocation5 + $0x50] ss:$8 sps:$4 sm:$0xff]   ;;  %v441_v12 = vld [vmem:[#allocation5 + $0x64] ss:$8 sps:$4 sm:$0xff]   ;;  %v473_v13 = vld [vmem:[#allocation3 + $0x4] ss:$8 sps:$4 sm:$0xff]  }
  0x2a   :  { %v443_v14 = vld [vmem:[#allocation5 + $0x60] ss:$8 sps:$4 sm:$0xff]   ;;  %v444_v15 = vld [vmem:[#allocation5 + $0x74] ss:$8 sps:$4 sm:$0xff]   ;;  %297 = vmatprep.mubr.bf16.mxu0 %v473_v13  ;;  %v446_v16 = vld [vmem:[#allocation5 + $0x70] ss:$8 sps:$4 sm:$0xff]  }
  0x2b   :  { %268 = vmatpush1.bf16.msra.mxu0 %v428_v3  ;;  %v447_v17 = vld [vmem:[#allocation5 + $0x84] ss:$8 sps:$4 sm:$0xff]   ;;  %v449_v18 = vld [vmem:[#allocation5 + $0x80] ss:$8 sps:$4 sm:$0xff]   ;;  %v450_v19 = vld [vmem:[#allocation5 + $0x94] ss:$8 sps:$4 sm:$0xff]  }
  0x2c   :  { %269 = vmatprep.subr.bf16.mxu0 %v429_v4  ;;  %v452_v20 = vld [vmem:[#allocation5 + $0x90] ss:$8 sps:$4 sm:$0xff]   ;;  %v453_v21 = vld [vmem:[#allocation5 + $0xa4] ss:$8 sps:$4 sm:$0xff]   ;;  %v455_v22 = vld [vmem:[#allocation5 + $0xa0] ss:$8 sps:$4 sm:$0xff]  }
  0x2d   :  { %v456_v23 = vld [vmem:[#allocation5 + $0xb4] ss:$8 sps:$4 sm:$0xff]   ;;  %v458_v24 = vld [vmem:[#allocation5 + $0xb0] ss:$8 sps:$4 sm:$0xff]   ;;  %v459_v25 = vld [vmem:[#allocation5 + $0xc4] ss:$8 sps:$4 sm:$0xff]  }
  0x2e   :  { %v461_v26 = vld [vmem:[#allocation5 + $0xc0] ss:$8 sps:$4 sm:$0xff]   ;;  %v462_v27 = vld [vmem:[#allocation5 + $0xd4] ss:$8 sps:$4 sm:$0xff]   ;;  %v464_v28 = vld [vmem:[#allocation5 + $0xd0] ss:$8 sps:$4 sm:$0xff]  }
  0x2f   :  { %270 = vmatpush1.bf16.msra.mxu0 %v431_v5  ;;  %v465_v29 = vld [vmem:[#allocation5 + $0xe4] ss:$8 sps:$4 sm:$0xff]   ;;  %v467_v30 = vld [vmem:[#allocation5 + $0xe0] ss:$8 sps:$4 sm:$0xff]   ;;  %v468_v31 = vld [vmem:[#allocation5 + $0xf4] ss:$8 sps:$4 sm:$0xff]  }
  0x30   :  { %271 = vmatprep.subr.bf16.mxu0 %v432_v6  ;;  %v470_v32 = vld [vmem:[#allocation5 + $0xf0] ss:$8 sps:$4 sm:$0xff]   ;;  %v86_v35 = vshrl.u32 %v85_v34, 7  ;;  %vm370_vm0 = vcmask 7168  }
  0x31   :  { %v471_v33 = vld [vmem:[#allocation3] ss:$8 sps:$4 sm:$0xff]  }
  0x32   :  { %v87_v36 = vsub.s32 0, %v86_v35  ;;  %v83_v37 = vld [vmem:[%s621_s2] sm:$0x3]  ;;  %v91_v38 = vsub.s32 1, %v86_v35 }
  0x33   :  { %272 = vmatpush1.bf16.msra.mxu0 %v434_v7  ;;  %v332_v61 = vld [vmem:[%s622_s3] sm:$0x3] }
  0x34   :  { %273 = vmatprep.subr.bf16.mxu0 %v435_v8  ;;  %v88_v39 = vrot.slane %v83_v37, %v87_v36  ;;  %v92_v40 = vrot.slane %v83_v37, %v91_v38  ;;  %v337_v62 = vrot.slane %v332_v61, %v87_v36  ;;  %v341_v63 = vrot.slane %v332_v61, %v91_v38 }
  0x37   :  { %274 = vmatpush1.bf16.msra.mxu0 %v437_v9 }
  0x38   :  { %275 = vmatprep.subr.bf16.mxu0 %v438_v10  ;;  %v355_v10 = vstv %s623_s4 }
  0x3b   :  { %276 = vmatpush1.bf16.msra.mxu0 %v440_v11 }
  0x3c   :  { %277 = vmatprep.subr.bf16.mxu0 %v441_v12 }
  0x3f   :  { %278 = vmatpush1.bf16.msra.mxu0 %v443_v14 }
  0x40   :  { %279 = vmatprep.subr.bf16.mxu0 %v444_v15 }
  0x43   :  { %280 = vmatpush1.bf16.msra.mxu0 %v446_v16 }
  0x44   :  { %281 = vmatprep.subr.bf16.mxu0 %v447_v17 }
  0x47   :  { %282 = vmatpush1.bf16.msra.mxu0 %v449_v18 }
  0x48   :  { %283 = vmatprep.subr.bf16.mxu0 %v450_v19 }
  0x4b   :  { %284 = vmatpush1.bf16.msra.mxu0 %v452_v20 }
  0x4c   :  { %285 = vmatprep.subr.bf16.mxu0 %v453_v21 }
  0x4f   :  { %286 = vmatpush1.bf16.msra.mxu0 %v455_v22 }
  0x50   :  { %287 = vmatprep.subr.bf16.mxu0 %v456_v23 }
  0x53   :  { %288 = vmatpush1.bf16.msra.mxu0 %v458_v24 }
  0x54   :  { %289 = vmatprep.subr.bf16.mxu0 %v459_v25 }
  0x57   :  { %290 = vmatpush1.bf16.msra.mxu0 %v461_v26 }
  0x58   :  { %291 = vmatprep.subr.bf16.mxu0 %v462_v27 }
  0x5b   :  { %292 = vmatpush1.bf16.msra.mxu0 %v464_v28 }
  0x5c   :  { %293 = vmatprep.subr.bf16.mxu0 %v465_v29 }
  0x5f   :  { %294 = vmatpush1.bf16.msra.mxu0 %v467_v30 }
  0x60   :  { %295 = vmatprep.subr.bf16.mxu0 %v468_v31 }
  0x63   :  { %296 = vmatpush1.bf16.msra.mxu0 %v470_v32 }
  0x66   :  { %298 = vmatmul.mubr.bf16.vlgmr.msra.gmra.mrb[0].mxu0 %v471_v33 }
 0x139   :  { %v299_v41 = vpop.f32.mrb[0].mxu0 }
 0x13a   :  { %v300_v42 = vadd.f32 %v299_v41, %v88_v39  ;;  %v301_v43 = vpop.f32.mrb[1].mxu0 }
 0x13b   :  { %v302_v44 = vadd.f32 %v301_v43, %v92_v40  ;;  %v303_v45 = vpop.f32.mrb[2].mxu0 }
 0x13c   :  { %v413_v46 = vmul.f32 -1.442695, %v300_v42  ;;  %v304_v47 = vadd.f32 %v303_v45, %v88_v39  ;;  %v305_v48 = vpop.f32.mrb[3].mxu0 }
 0x13d   :  { %v414_v49 = vmul.f32 -1.442695, %v302_v44  ;;  %v306_v50 = vadd.f32 %v305_v48, %v92_v40 }
 0x13e   :  { %474 = vpow2.f32 %v413_v46  ;;  %v415_v51 = vmul.f32 -1.442695, %v304_v47 }
 0x13f   :  { %476 = vpow2.f32 %v414_v49  ;;  %v416_v52 = vmul.f32 -1.442695, %v306_v50 }
 0x140   :  { %478 = vpow2.f32 %v415_v51 }
 0x141   :  { %480 = vpow2.f32 %v416_v52 }
 0x148   :  { %v475_v53 = vpop.eup %474 }
 0x149   :  { %v477_v54 = vpop.eup %476  ;;  %v320_v55 = vadd.f32 1.0, %v475_v53 }
 0x14a   :  { %v479_v56 = vpop.eup %478  ;;  %v321_v57 = vadd.f32 1.0, %v477_v54 }
 0x14b   :  { %v481_v58 = vpop.eup %480  ;;  %482 = vrcp.f32 %v320_v55  ;;  %v322_v59 = vadd.f32 1.0, %v479_v56 }
 0x14c   :  { %484 = vrcp.f32 %v321_v57  ;;  %v323_v60 = vadd.f32 1.0, %v481_v58 }
 0x14d   :  { %486 = vrcp.f32 %v322_v59 }
 0x14e   :  { %488 = vrcp.f32 %v323_v60 }
 0x155   :  { %v483_v0 = vpop.eup %482 }
 0x156   :  { %v485_v1 = vpop.eup %484  ;;  %v344_v2 = vmul.f32 %v483_v0, %v337_v62 }
 0x157   :  { %v487_v3 = vpop.eup %486  ;;  %v345_v4 = vmul.f32 %v485_v1, %v341_v63 }
 0x158   :  { %v489_v5 = vpop.eup %488  ;;  %v346_v6 = vmul.f32 %v487_v3, %v337_v62 }
 0x159   :  { %v348_v7 = vadd.f32 %v345_v4, %v344_v2  ;;  %v347_v8 = vmul.f32 %v489_v5, %v341_v63 }
 0x15b   :  { %349 = vadd.xlane.f32.xlu0 %v348_v7  ;;  %v351_v9 = vadd.f32 %v347_v8, %v346_v6 }
 0x15f   :  { %352 = vadd.xlane.f32.xlu0 %v351_v9 }
 0x1e8   :  { %v350_v11 = vpop.xlane.xlu0 %349 }
 0x1e9   :  { %v356_v12 = vadd.f32 %v355_v10, %v350_v11 }
 0x1eb   :  { %v417_v13 = vmul.f32 -1.442695, %v356_v12 }
 0x1ec   :  { %v353_v14 = vpop.xlane.xlu0 %352 }
 0x1ed   :  { %490 = vpow2.f32 %v417_v13  ;;  %v357_v15 = vadd.f32 %v355_v10, %v353_v14 }
 0x1ef   :  { %v418_v16 = vmul.f32 -1.442695, %v357_v15 }
 0x1f1   :  { %492 = vpow2.f32 %v418_v16 }
 0x1f7   :  { %v491_v17 = vpop.eup %490 }
 0x1f8   :  { %v364_v18 = vadd.f32 1.0, %v491_v17 }
 0x1fa   :  { %494 = vrcp.f32 %v364_v18 }
 0x1fb   :  { %v493_v19 = vpop.eup %492 }
 0x1fc   :  { %v365_v20 = vadd.f32 1.0, %v493_v19 }
 0x1fe   :  { %496 = vrcp.f32 %v365_v20 }
 0x204   :  { %v495_v21 = vpop.eup %494 }
 0x205   :  { %371 = vst.msk [vmem:[%s624_s5] sm:$0xff] %vm370_vm0, %v495_v21 }
 0x208   :  { %v497_v22 = vpop.eup %496 }
 0x209   :  { %372 = vst.msk [vmem:[%s624_s5 + $0x8] sm:$0xff] %vm370_vm0, %v497_v22 }
 0x20a   :  { %377 = vsyncpa [#allocation4], 1 }
 0x20b   :  { %378 = vsyncpa [#allocation6], 1 }

</bundles_post_ra>
